<compile_context>
chip_gen: v7x
topology: tpu7x:2x2x1
jax: 0.10.0
libtpu: 0.0.40
codegen_flags: <defaults>
</compile_context>

<pallas_src>
import functools

import jax
import jax.numpy as jnp
from jax.experimental import pallas as pl
from jax.experimental.pallas import tpu as pltpu

# ----------------------------- problem sizes --------------------------------
N_VERTS   = 16          # number of hypergraph vertices
N_EDGES   = 8           # number of hyperedges
IN_DIM    = 32          # input feature dim
OUT_DIM   = 64          # output feature dim
DROP_RATE = 0.5         # nn.Dropout(p)
LANE      = 128         # TPU lane width; pad feature dim to this


# ------------------------------- the kernel ---------------------------------
def cascade_conv_kernel(x_ref, wt_ref, b_ref, p_ref, u_ref, o_ref, *, drop_rate):
    # x_ref  : (N, IN_DIM)        vertex features
    # wt_ref : (IN_DIM, D_PAD)    theta weight, pre-transposed, lane-padded
    # b_ref  : (1, D_PAD)         theta bias, lane-padded
    # p_ref  : (N, N)             fused propagation matrix diag(1/dv) H diag(1/de) H^T
    # u_ref  : (N, D_PAD)         uniform [0,1) randoms for the dropout mask
    # o_ref  : (N, D_PAD)         output vertex features (lane-padded)

    # theta: X @ W^T + b   (MXU, lane-dense 128-wide result)
    x1 = jnp.dot(x_ref[...], wt_ref[...],
                 preferred_element_type=jnp.float32) + b_ref[...]

    # fused v2e(mean) + e2v(mean):  X_ = P @ X1   (single small MXU matmul)
    x2 = jnp.dot(p_ref[...], x1, preferred_element_type=jnp.float32)

    # ReLU
    x2 = jnp.maximum(x2, 0.0)

    # Dropout (training semantics: zero w.p. p, scale survivors by 1/(1-p))
    if drop_rate > 0.0:
        keep = u_ref[...] >= jnp.float32(drop_rate)
        scale = jnp.float32(1.0 / (1.0 - drop_rate))
        x2 = jnp.where(keep, x2 * scale, 0.0)

    o_ref[...] = x2.astype(o_ref.dtype)


# ------------------------------- the wrapper ---------------------------------
def cascade_conv(x, weight, bias, h, *, dropout_key, drop_rate=DROP_RATE,
                 training=True):
    """x: (N, IN_DIM), weight: (OUT_DIM, IN_DIM), bias: (OUT_DIM,), h: (N, E) 0/1."""
    n, d_in = x.shape
    d_out = weight.shape[0]
    d_pad = ((d_out + LANE - 1) // LANE) * LANE   # pad feature dim to 128 lanes

    x = x.astype(jnp.float32)
    h = h.astype(jnp.float32)

    # Degree normalizations and both aggregations, folded into one N x N matrix:
    #   P = diag(1/deg_v) @ H @ diag(1/deg_e) @ H^T
    # (empty edges / isolated vertices clamp to 1; numerator is 0 there anyway,
    #  matching "mean over empty set = 0").
    de = jnp.maximum(jnp.sum(h, axis=0), 1.0)               # (E,)
    dv = jnp.maximum(jnp.sum(h, axis=1), 1.0)               # (N,)
    p_mat = ((h / de[None, :]) @ h.T) * (1.0 / dv)[:, None]  # (N, N)

    # Lane-pad weight (pre-transposed) and bias with zeros -> padded cols are 0.
    wt = jnp.zeros((d_in, d_pad), jnp.float32).at[:, :d_out].set(
        weight.astype(jnp.float32).T)
    b2 = jnp.zeros((1, d_pad), jnp.float32).at[:, :d_out].set(
        bias.astype(jnp.float32))

    # Fresh dropout randoms per call (PyTorch nn.Dropout training semantics).
    p_eff = float(drop_rate) if training else 0.0
    if p_eff > 0.0:
        u = jax.random.uniform(dropout_key, (n, d_pad), jnp.float32)
    else:
        u = jnp.ones((n, d_pad), jnp.float32)   # keep-all (eval / p=0)

    vmem = pl.BlockSpec(memory_space=pltpu.MemorySpace.VMEM)
    out_pad = pl.pallas_call(
        functools.partial(cascade_conv_kernel, drop_rate=p_eff),
        out_shape=jax.ShapeDtypeStruct((n, d_pad), jnp.float32),
        in_specs=[vmem, vmem, vmem, vmem, vmem],
        out_specs=vmem,
    )(x, wt, b2, p_mat, u)

    return out_pad[:, :d_out]


# --------------------------------- driver ------------------------------------
if __name__ == "__main__":
    key = jax.random.PRNGKey(0)
    kx, kw, kb, kh, kdrop = jax.random.split(key, 5)

    # deterministic parameter init (synthetic; matches nn.Linear shapes)
    x = jax.random.normal(kx, (N_VERTS, IN_DIM), jnp.float32)
    weight = (jax.random.normal(kw, (OUT_DIM, IN_DIM), jnp.float32)
              * (1.0 / jnp.sqrt(IN_DIM)))
    bias = jax.random.normal(kb, (OUT_DIM,), jnp.float32) * 0.01

    # deterministic random hypergraph incidence matrix (N, E) of 0/1 floats
    h = (jax.random.uniform(kh, (N_VERTS, N_EDGES)) < 0.4).astype(jnp.float32)

    out = cascade_conv(x, weight, bias, h, dropout_key=kdrop,
                       drop_rate=DROP_RATE, training=True)
    jax.block_until_ready(out)
    assert out.shape == (N_VERTS, OUT_DIM)
    print("KERNEL_OK")
</pallas_src>

<mosaic_0001>
module attributes {stable_mosaic.version = 11 : i64} {
  func.func @cascade_conv_kernel(%arg0: memref<16x32xf32, #tpu.memory_space<vmem>>, %arg1: memref<32x128xf32, #tpu.memory_space<vmem>>, %arg2: memref<1x128xf32, #tpu.memory_space<vmem>>, %arg3: memref<16x16xf32, #tpu.memory_space<vmem>>, %arg4: memref<16x128xf32, #tpu.memory_space<vmem>>, %arg5: memref<16x128xf32, #tpu.memory_space<vmem>>) attributes {dimension_semantics = [], scalar_prefetch = 0 : i64, scratch_operands = 0 : i64, tpu.core_type = #tpu.core_type<tc>} {
    %c0 = arith.constant 0 : index
    %c0_0 = arith.constant 0 : index
    %0 = vector.load %arg0[%c0, %c0_0] : memref<16x32xf32, #tpu.memory_space<vmem>>, vector<16x32xf32>
    %c0_1 = arith.constant 0 : index
    %c0_2 = arith.constant 0 : index
    %1 = vector.load %arg1[%c0_1, %c0_2] : memref<32x128xf32, #tpu.memory_space<vmem>>, vector<32x128xf32>
    %cst = arith.constant dense<0.000000e+00> : vector<16x128xf32>
    %2 = tpu.matmul %0, %1, %cst {dimension_numbers = #tpu.dot_dimension_numbers<[1], [0], [0], [1], [0, 0, 1, 1], [], []>} : vector<16x32xf32>, vector<32x128xf32>, vector<16x128xf32> -> vector<16x128xf32>
    %c0_3 = arith.constant 0 : index
    %c0_4 = arith.constant 0 : index
    %3 = vector.load %arg2[%c0_3, %c0_4] : memref<1x128xf32, #tpu.memory_space<vmem>>, vector<1x128xf32>
    %4 = vector.broadcast %3 : vector<1x128xf32> to vector<16x128xf32>
    %5 = arith.addf %2, %4 : vector<16x128xf32>
    %c0_5 = arith.constant 0 : index
    %c0_6 = arith.constant 0 : index
    %6 = vector.load %arg3[%c0_5, %c0_6] : memref<16x16xf32, #tpu.memory_space<vmem>>, vector<16x16xf32>
    %cst_7 = arith.constant dense<0.000000e+00> : vector<16x128xf32>
    %7 = tpu.matmul %6, %5, %cst_7 {dimension_numbers = #tpu.dot_dimension_numbers<[1], [0], [0], [1], [0, 0, 1, 1], [], []>} : vector<16x16xf32>, vector<16x128xf32>, vector<16x128xf32> -> vector<16x128xf32>
    %cst_8 = arith.constant 0.000000e+00 : f32
    %8 = vector.broadcast %cst_8 : f32 to vector<16x128xf32>
    %9 = arith.maximumf %7, %8 : vector<16x128xf32>
    %c0_9 = arith.constant 0 : index
    %c0_10 = arith.constant 0 : index
    %10 = vector.load %arg4[%c0_9, %c0_10] : memref<16x128xf32, #tpu.memory_space<vmem>>, vector<16x128xf32>
    %cst_11 = arith.constant 5.000000e-01 : f32
    %11 = vector.broadcast %cst_11 : f32 to vector<16x128xf32>
    %12 = arith.cmpf oge, %10, %11 : vector<16x128xf32>
    %cst_12 = arith.constant 2.000000e+00 : f32
    %13 = vector.broadcast %cst_12 : f32 to vector<16x128xf32>
    %14 = arith.mulf %9, %13 : vector<16x128xf32>
    %cst_13 = arith.constant 0.000000e+00 : f32
    %15 = vector.broadcast %cst_13 : f32 to vector<16x128xf32>
    %16 = arith.select %12, %14, %15 : vector<16x128xi1>, vector<16x128xf32>
    %c0_14 = arith.constant 0 : index
    %c0_15 = arith.constant 0 : index
    %17 = vector.load %arg5[%c0_14, %c0_15] : memref<16x128xf32, #tpu.memory_space<vmem>>, vector<16x128xf32>
    tpu.vector_store %arg5[%c0_14, %c0_15], %16 {strides = array<i32>} : memref<16x128xf32, #tpu.memory_space<vmem>>, vector<16x128xf32>,
    return
  }
}

</mosaic_0001>

<bundles_post_ra>
// kernel: tpu_custom_call.1
= control target key start
LH: loop header
LB: loop body
LE: loop exit
PB: predicated region body
PF: predicated region fallthrough
CT: control target
= control target key end

     0   :  { %10 = vsyncpa [#allocation3], 0  ;;  %s585_s0 = inlined_call_operand.hbm [shape: f32[16,32], index: 0, kind: input, shape index: {}]   ;;  %s586_s1 = inlined_call_operand.hbm [shape: f32[32,128], index: 1, kind: input, shape index: {}]   ;;  %s587_s2 = inlined_call_operand.vmem [shape: f32[1,128], index: 2, kind: input, shape index: {}]   ;;  %s588_s3 = inlined_call_operand.hbm [shape: f32[16,16], index: 3, kind: input, shape index: {}]   ;;  %s589_s4 = inlined_call_operand.hbm [shape: f32[16,128], index: 4, kind: input, shape index: {}]   ;;  %s590_s5 = inlined_call_operand.hbm [shape: f32[16,128], index: 5, kind: output, shape index: {}]  }
   0x1   :  { %11 = vsyncpa [#allocation6], 0 }
   0x2   :  { %12 = vsyncpa [#allocation9], 0 }
   0x3   :  { %13 = vsyncpa [#allocation4], 0  ;;  %s456_s18 = smov [#allocation5]   ;;  %s457_s20 = smov [#allocation2]  }
   0x4   :  { %s31_s19 = sshll.u32 %s456_s18, 4  ;;  %s19_s21 = sshll.u32 %s457_s20, 4  ;;  %s32_s19 = int_to_ptr.vmem [resolvable:$true] %s31_s19  ;;  %s493_s21 = int_to_ptr.vmem [resolvable:$true] %s19_s21 }
   0x5   :  { %s338_s24 = scalar_lea.hbm %s586_s1, 512 }
   0x6   :  { %p339_p0 = scmp.ne.s32.totalorder %s586_s1, %s338_s24  ;;  %p342_p1 = scmp.lt.u32.totalorder %s338_s24, %s586_s1 }
   0x8   :  { %p344_p2 = pnand %p342_p1, %p339_p0 }
   0xa   :  { %347 = shalt.err (!%p344_p2)
}
   0xb   :  { %s348_s29 = scalar_lea.vmem %s32_s19, 512  ;;  %p353_p4 = scmp.lt.s32.totalorder %s32_s19, %s32_s19 }
   0xc   :  { %p349_p3 = scmp.ne.s32.totalorder %s32_s19, %s348_s29  ;;  %p354_p5 = scmp.lt.s32.totalorder %s348_s29, %s348_s29 }
   0xe   :  { %p355_p6 = por %p354_p5, %p353_p4 }
  0x10   :  { %p356_p7 = pnand %p355_p6, %p349_p3 }
  0x12   :  { %359 = shalt.err (!%p356_p7)
}
  0x13   :  { %s458_s30 = smov 128   ;;  %s459_s6 = smov 8  }
  0x14   :  { %37 = dma.hbm_to_vmem [thread:$0]  %s586_s1, 512, %s32_s19, [#allocation6], %s458_s30, %s458_s30, %s459_s6  }
  0x15   :  { %s360_s11 = scalar_lea.hbm %s585_s0, 256 }
  0x16   :  { %p361_p8 = scmp.ne.s32.totalorder %s585_s0, %s360_s11  ;;  %p364_p9 = scmp.lt.u32.totalorder %s360_s11, %s585_s0 }
  0x18   :  { %p366_p10 = pnand %p364_p9, %p361_p8 }
  0x1a   :  { %369 = shalt.err (!%p366_p10)
}
  0x1b   :  { %s370_s16 = scalar_lea.vmem %s493_s21, 256  ;;  %p375_p12 = scmp.lt.s32.totalorder %s493_s21, %s493_s21 }
  0x1c   :  { %p371_p11 = scmp.ne.s32.totalorder %s493_s21, %s370_s16  ;;  %p376_p13 = scmp.lt.s32.totalorder %s370_s16, %s370_s16 }
  0x1e   :  { %p377_p0 = por %p376_p13, %p375_p12 }
  0x20   :  { %p378_p1 = pnand %p377_p0, %p371_p11 }
  0x22   :  { %381 = shalt.err (!%p378_p1)
}
  0x23   :  { %25 = dma.hbm_to_vmem [thread:$0]  %s585_s0, 256, %s493_s21, [#allocation3], %s458_s30, %s458_s30, %s459_s6  }
  0x24   :  { %s460_s18 = smov [#allocation7]   ;;  %s461_s20 = smov [#allocation8]  }
  0x25   :  { %s45_s19 = sshll.u32 %s460_s18, 4  ;;  %s57_s22 = sshll.u32 %s461_s20, 4  ;;  %s46_s19 = int_to_ptr.vmem [resolvable:$true] %s45_s19  ;;  %s530_s22 = int_to_ptr.vmem [resolvable:$true] %s57_s22 }
  0x26   :  { %s382_s25 = scalar_lea.hbm %s588_s3, 256 }
  0x27   :  { %p383_p2 = scmp.ne.s32.totalorder %s588_s3, %s382_s25  ;;  %p386_p3 = scmp.lt.u32.totalorder %s382_s25, %s588_s3 }
  0x29   :  { %p388_p4 = pnand %p386_p3, %p383_p2 }
  0x2b   :  { %391 = shalt.err (!%p388_p4)
}
  0x2c   :  { %s392_s0 = scalar_lea.vmem %s46_s19, 256  ;;  %p397_p6 = scmp.lt.s32.totalorder %s46_s19, %s46_s19 }
  0x2d   :  { %p393_p5 = scmp.ne.s32.totalorder %s46_s19, %s392_s0  ;;  %p398_p7 = scmp.lt.s32.totalorder %s392_s0, %s392_s0 }
  0x2f   :  { %p399_p8 = por %p398_p7, %p397_p6 }
  0x31   :  { %p400_p9 = pnand %p399_p8, %p393_p5 }
  0x33   :  { %403 = shalt.err (!%p400_p9)
}
  0x34   :  { %51 = dma.hbm_to_vmem [thread:$0]  %s588_s3, 256, %s46_s19, [#allocation6], %s458_s30, %s458_s30, %s459_s6  }
  0x35   :  { %s404_s10 = scalar_lea.hbm %s589_s4, 256 }
  0x36   :  { %p405_p10 = scmp.ne.s32.totalorder %s589_s4, %s404_s10  ;;  %p408_p11 = scmp.lt.u32.totalorder %s404_s10, %s589_s4 }
  0x38   :  { %p410_p12 = pnand %p408_p11, %p405_p10 }
  0x3a   :  { %413 = shalt.err (!%p410_p12)
}
  0x3b   :  { %s414_s15 = scalar_lea.vmem %s530_s22, 256  ;;  %p419_p0 = scmp.lt.s32.totalorder %s530_s22, %s530_s22 }
  0x3c   :  { %p415_p13 = scmp.ne.s32.totalorder %s530_s22, %s414_s15  ;;  %p420_p1 = scmp.lt.s32.totalorder %s414_s15, %s414_s15 }
  0x3e   :  { %p421_p2 = por %p420_p1, %p419_p0 }
  0x40   :  { %p422_p3 = pnand %p421_p2, %p415_p13 }
  0x42   :  { %425 = shalt.err (!%p422_p3)
}
  0x43   :  { %63 = dma.hbm_to_vmem [thread:$0]  %s589_s4, 256, %s530_s22, [#allocation9], %s458_s30, %s458_s30, %s459_s6  }
  0x44   :  { %448 = dma.done.wait [#allocation3], 256  }
  0x45   :  { %449 = vsyncadd [#allocation3], 4294967040 }
  0x46   :  { %450 = dma.done.wait [#allocation6], 768  }
  0x47   :  { %451 = vsyncadd [#allocation6], 4294966528 }
  0x48   :  { %452 = dma.done.wait [#allocation9], 256  }
  0x49   :  { %453 = vsyncadd [#allocation9], 4294967040  ;;  %vm89_vm0 = vcmask 261120   ;;  %v78_v0 = vld [vmem:[#allocation5] sm:$0xff]  ;;  %v79_v1 = vld [vmem:[#allocation5 + $0x8] sm:$0xff]  ;;  %vm173_vm1 = vcmask 130048  }
  0x4a   :  { %v80_v2 = vld [vmem:[#allocation5 + $0x10] sm:$0xff]  ;;  %v319_v3 = vpack.c.bf16 %v79_v1, %v78_v0  ;;  %v81_v4 = vld [vmem:[#allocation5 + $0x18] sm:$0xff]  ;;  %v171_v8 = vld [vmem:[#allocation7] sm:$0xff]  ;;  %s462_s17 = smov [#allocation10]  }
  0x4b   :  { %v76_v5 = vld [vmem:[#allocation2] sm:$0xff]  ;;  %v323_v6 = vpack.c.bf16 %v81_v4, %v80_v2  ;;  %v77_v7 = vld [vmem:[#allocation2 + $0x8] sm:$0xff]  ;;  %316 = vmatprep.mubr.msk.f32.mxu1 %vm173_vm1, %v171_v8  ;;  %v172_v15 = vld [vmem:[#allocation7 + $0x8] sm:$0xff]  ;;  %s272_s18 = sshll.u32 %s462_s17, 4  ;;  %s273_s18 = int_to_ptr.vmem [resolvable:$true] %s272_s18 }
  0x4c   :  { %309 = vmatprep.mubr.msk.f32.mxu0 %vm89_vm0, %v76_v5  ;;  %320 = vmatprep.subr.bf16.mxu0 %v319_v3  ;;  %v286_v9 = vld [vmem:[%s587_s2] ss:$0 sm:$0xff]  ;;  %v258_v16 = vld [vmem:[#allocation8 + $0x8] sm:$0xff]  ;;  %s426_s2 = scalar_lea.vmem %s273_s18, 256  ;;  %p431_p5 = scmp.lt.s32.totalorder %s273_s18, %s273_s18 }
  0x4d   :  { %322 = vmatpush3.bf16.msra.mxu0 %v319_v3  ;;  %v257_v18 = vld [vmem:[#allocation8] sm:$0xff]  ;;  %vm260_vm2 = vcmp.ge.f32.partialorder %v258_v16, 0.5  ;;  %p427_p4 = scmp.ne.s32.totalorder %s273_s18, %s426_s2  ;;  %p432_p6 = scmp.lt.s32.totalorder %s426_s2, %s426_s2 }
  0x4e   :  { %324 = vmatprep.subr.bf16.mxu0 %v323_v6  ;;  %vm259_vm3 = vcmp.ge.f32.partialorder %v257_v18, 0.5 }
  0x4f   :  { %p433_p7 = por %p432_p6, %p431_p5 }
  0x51   :  { %326 = vmatpush3.bf16.msra.mxu0 %v323_v6  ;;  %p434_p8 = pnand %p433_p7, %p427_p4 }
  0x54   :  { %310 = vmatmul.mubr.msk.f32.vlgmr.msra.gmra.mrb[0].mxu0 %vm89_vm0, %v77_v7 }
 0x127   :  { %v311_v10 = vpop.f32.mrb[0].mxu0 }
 0x128   :  { %v168_v11 = vadd.f32 %v311_v10, %v286_v9  ;;  %v162_v12 = vpop.f32.mrb[1].mxu0 }
 0x129   :  { %v163_v13 = vadd.f32 %v286_v9, %v162_v12 }
 0x12b   :  { %v327_v14 = vpack.c.bf16 %v168_v11, %v163_v13 }
 0x12d   :  { %328 = vmatprep.subr.bf16.mxu1 %v327_v14 }
 0x12e   :  { %330 = vmatpush3.bf16.msra.mxu1 %v327_v14 }
 0x131   :  { %317 = vmatmul.mubr.msk.f32.vlgmr.msra.gmra.mrb[0].mxu1 %vm173_vm1, %v172_v15 }
 0x204   :  { %v318_v17 = vpop.f32.mrb[0].mxu1 }
 0x205   :  { %v256_v19 = vmax.f32 %v318_v17, 0.0  ;;  %v246_v20 = vpop.f32.mrb[1].mxu1 }
 0x206   :  { %v255_v21 = vmax.f32 %v246_v20, 0.0 }
 0x207   :  { %v262_v22 = vmul.f32 2.0, %v256_v19 }
 0x208   :  { %v261_v23 = vmul.f32 2.0, %v255_v21 }
 0x209   :  { %v264_v24 = vsel %vm260_vm2, %v262_v22, 0.0 }
 0x20a   :  { %266 = vst [vmem:[#allocation10 + $0x8] sm:$0xff] %v264_v24  ;;  %v263_v25 = vsel %vm259_vm3, %v261_v23, 0.0 }
 0x20b   :  { %265 = vst [vmem:[#allocation10] sm:$0xff] %v263_v25 }
 0x20c   :  { %437 = shalt.err (!%p434_p8)
}
 0x20d   :  { %s438_s22 = scalar_lea.hbm %s590_s5, 256 }
 0x20e   :  { %p439_p9 = scmp.ne.s32.totalorder %s590_s5, %s438_s22  ;;  %p442_p10 = scmp.lt.u32.totalorder %s438_s22, %s590_s5 }
 0x210   :  { %p444_p11 = pnand %p442_p10, %p439_p9 }
 0x212   :  { %447 = shalt.err (!%p444_p11)
}
 0x213   :  { %278 = dma.vmem_to_hbm [thread:$0]  %s273_s18, 256, %s590_s5, [#allocation4], %s458_s30, %s458_s30, %s459_s6  }
 0x214   :  { %454 = dma.done.wait [#allocation4], 256  }
 0x215   :  { %455 = vsyncadd [#allocation4], 4294967040 }
 0x216   :  { %282 = vsyncpa [#allocation3], 1 }
 0x217   :  { %283 = vsyncpa [#allocation6], 1 }
 0x218   :  { %284 = vsyncpa [#allocation9], 1 }
 0x219   :  { %285 = vsyncpa [#allocation4], 1 }

</bundles_post_ra>
